<compile_context>
chip_gen: v7x
topology: tpu7x:2x2x1
jax: 0.10.0
libtpu: 0.0.40
codegen_flags: <defaults>
</compile_context>

<pallas_src>
import jax
import jax.numpy as jnp
from jax.experimental import pallas as pl
from jax.experimental.pallas import tpu as pltpu


_LANE = 128                       # TPU lane width: keep expert axis lane-dense
_VMEM_BUDGET = 48 * 1024 * 1024   # leave headroom on v7x's 64 MiB per-TC VMEM


def _round_up(x: int, m: int) -> int:
    return ((x + m - 1) // m) * m


def _row_align(dtype) -> int:
    """Sublane packing granularity for the token (row) axis."""
    itemsize = jnp.dtype(dtype).itemsize
    if itemsize == 1:
        return 32
    if itemsize == 2:
        return 16
    return 8


def prepare_qwen3_gate_weight(weight: jax.Array) -> jax.Array:
    """One-time (init-time) prep of the gate parameter.

    weight: [num_experts, hidden_size] (PyTorch nn.Parameter layout).
    Returns [hidden_size, E_pad] with the expert axis padded to a multiple of
    128 so output stores are always unmasked / lane-dense.  Call ONCE at model
    init, not per forward.
    """
    E, H = weight.shape
    wt = weight.T  # [H, E]
    E_pad = _round_up(E, _LANE)
    if E_pad != E:
        wt = jnp.pad(wt, ((0, 0), (0, E_pad - E)))
    return wt


def _qwen3_gate_kernel(x_ref, wt_ref, o_ref):
    # x_ref : (tm, H)      token slab (streamed / double-buffered by Pallas)
    # wt_ref: (H, E_pad)   whole pre-transposed gate weight (single VMEM buffer)
    # o_ref : (tm, E_pad)  logits slab
    o_ref[...] = jnp.dot(
        x_ref[...], wt_ref[...], preferred_element_type=jnp.float32
    ).astype(o_ref.dtype)
    # TODO(synk): the router softmax / top-k pre-mask could be fused here for
    # free (EUP/XLU are idle in this DMA-bound kernel), but Qwen3Gate.forward
    # returns raw logits (routing happens inside the MoE), so we keep exact
    # module semantics.


def qwen3_gate(hidden_states: jax.Array,
               weight_t: jax.Array,
               *,
               num_experts: int | None = None,
               out_dtype=None,
               tm: int | None = None) -> jax.Array:
    """Router gate: logits = hidden_states @ weight.T, cast to out_dtype.

    `weight_t` must come from `prepare_qwen3_gate_weight` ([H, E_pad]).
    """
    T, H = hidden_states.shape
    Hw, E_pad = weight_t.shape
    assert H == Hw, "hidden_size mismatch"
    E = num_experts if num_experts is not None else E_pad
    assert E <= E_pad
    out_dtype = out_dtype if out_dtype is not None else hidden_states.dtype

    row_align = _row_align(hidden_states.dtype)

    if tm is None:
        if T <= 2 * row_align:
            # Tiny decode batch: a single grid step is unavoidable / optimal.
            tm = _round_up(max(T, 1), row_align)
        else:
            # Aim for >= 2 grid steps so v7x megacore can shard the token
            # axis; cap at 1024 rows for VMEM headroom.
            tm = min(1024, _round_up(pl.cdiv(T, 2), row_align))
    tm = max(row_align, _round_up(tm, row_align))

    # VMEM footprint: 2x input buffers + 1x weight + 2x output buffers.
    def vmem_bytes(rows: int) -> int:
        return (2 * rows * H * hidden_states.dtype.itemsize
                + H * E_pad * weight_t.dtype.itemsize
                + 2 * rows * E_pad * jnp.dtype(out_dtype).itemsize)

    while tm > row_align and vmem_bytes(tm) > _VMEM_BUDGET:
        tm = max(row_align, _round_up(tm // 2, row_align))

    # Ragged T: rows are independent and Pallas clips the partial last output
    # block on writeback, so no jnp.pad copy of hidden_states is needed.
    grid = (pl.cdiv(T, tm),)

    cost = pl.CostEstimate(
        flops=2 * T * H * E_pad,
        transcendentals=0,
        bytes_accessed=(T * H * hidden_states.dtype.itemsize
                        + H * E_pad * weight_t.dtype.itemsize
                        + T * E_pad * jnp.dtype(out_dtype).itemsize),
    )

    out = pl.pallas_call(
        _qwen3_gate_kernel,
        out_shape=jax.ShapeDtypeStruct((T, E_pad), out_dtype),
        grid=grid,
        in_specs=[
            # (tm, H) row-slab of tokens per grid step (double-buffered).
            pl.BlockSpec((tm, H), lambda i: (i, 0)),
            # Whole [H, E_pad] weight, same block every step -> DMA'd once;
            # single buffer (no point double-buffering an invariant block).
            pl.BlockSpec((H, E_pad), lambda i: (0, 0),
                         pipeline_mode=pl.Buffered(1)),
        ],
        out_specs=pl.BlockSpec((tm, E_pad), lambda i: (i, 0)),
        compiler_params=pltpu.CompilerParams(
            dimension_semantics=("parallel",),
            # Explicit limit: v5e's scoped default is only 16 MiB.
            vmem_limit_bytes=min(64 * 1024 * 1024,
                                 int(vmem_bytes(tm) * 1.5) + (4 << 20)),
        ),
        cost_estimate=cost,
    )(hidden_states, weight_t)

    return out if E_pad == E else out[:, :E]


if __name__ == "__main__":
    # Small shapes consistent with the module's forward:
    #   hidden_states: [num_tokens, hidden_size], weight: [num_experts, hidden_size]
    num_tokens = 16
    hidden_size = 256
    num_experts = 128
    dtype = jnp.bfloat16  # Qwen3Gate's out_dtype / parameter dtype

    key = jax.random.PRNGKey(0)
    kx, kw = jax.random.split(key)
    hidden_states = jax.random.normal(
        kx, (num_tokens, hidden_size), jnp.float32).astype(dtype)
    # Deterministic synthetic gate weight (nn.Parameter of shape (E, H)).
    weight = (jax.random.normal(kw, (num_experts, hidden_size), jnp.float32)
              * 0.02).astype(dtype)

    # One-time weight prep (the "load_weights"/init step): transpose + pad.
    weight_t = prepare_qwen3_gate_weight(weight)
    weight_t = jax.block_until_ready(weight_t)

    # --- aligned case, bf16 logits (parity with PyTorch out_dtype) ---
    logits = qwen3_gate(hidden_states, weight_t,
                        num_experts=num_experts, out_dtype=dtype)
    logits = jax.block_until_ready(logits)

    ref = jnp.dot(hidden_states.astype(jnp.float32),
                  weight.astype(jnp.float32).T)
    assert logits.shape == (num_tokens, num_experts)
    assert logits.dtype == dtype
    assert jnp.allclose(logits.astype(jnp.float32), ref, atol=2e-2, rtol=2e-2)

    # --- ragged token count + f32 logits (exercises pad-free partial block) ---
    ragged_T = 13
    x_ragged = hidden_states[:ragged_T]
    logits_f32 = qwen3_gate(x_ragged, weight_t,
                            num_experts=num_experts, out_dtype=jnp.float32)
    logits_f32 = jax.block_until_ready(logits_f32)
    ref_ragged = jnp.dot(x_ragged.astype(jnp.float32),
                         weight.astype(jnp.float32).T)
    assert logits_f32.shape == (ragged_T, num_experts)
    assert logits_f32.dtype == jnp.float32
    assert jnp.allclose(logits_f32, ref_ragged, atol=2e-2, rtol=2e-2)

    # --- small expert count (exercises the lane-padding insurance path) ---
    small_E = 64
    weight_small = weight[:small_E]
    wt_small = prepare_qwen3_gate_weight(weight_small)   # padded to E_pad=128
    logits_small = qwen3_gate(hidden_states, wt_small,
                              num_experts=small_E, out_dtype=jnp.float32)
    logits_small = jax.block_until_ready(logits_small)
    ref_small = jnp.dot(hidden_states.astype(jnp.float32),
                        weight_small.astype(jnp.float32).T)
    assert logits_small.shape == (num_tokens, small_E)
    assert jnp.allclose(logits_small, ref_small, atol=2e-2, rtol=2e-2)

    print("KERNEL_OK")
</pallas_src>

<mosaic_0001>
module attributes {stable_mosaic.version = 11 : i64} {
  func.func @_qwen3_gate_kernel(%arg0: i32, %arg1: memref<16x256xbf16, #tpu.memory_space<vmem>>, %arg2: memref<256x128xbf16, #tpu.memory_space<vmem>>, %arg3: memref<16x128xbf16, #tpu.memory_space<vmem>>) attributes {dimension_semantics = [#tpu.dimension_semantics<parallel>], iteration_bounds = array<i64: 1>, scalar_prefetch = 0 : i64, scratch_operands = 0 : i64, tpu.core_type = #tpu.core_type<tc>, window_params = [{transform_indices = @transform_0, window_bounds = array<i64: 16, 256>}, {pipeline_mode = #tpu.pipeline_mode<synchronous>, transform_indices = @transform_1, window_bounds = array<i64: 256, 128>}, {transform_indices = @transform_2, window_bounds = array<i64: 16, 128>}]} {
    %c0 = arith.constant 0 : index
    %c0_0 = arith.constant 0 : index
    %0 = vector.load %arg1[%c0, %c0_0] : memref<16x256xbf16, #tpu.memory_space<vmem>>, vector<16x256xbf16>
    %c0_1 = arith.constant 0 : index
    %c0_2 = arith.constant 0 : index
    %1 = vector.load %arg2[%c0_1, %c0_2] : memref<256x128xbf16, #tpu.memory_space<vmem>>, vector<256x128xbf16>
    %cst = arith.constant dense<0.000000e+00> : vector<16x128xf32>
    %2 = tpu.matmul %0, %1, %cst {dimension_numbers = #tpu.dot_dimension_numbers<[1], [0], [0], [1], [0, 0, 1, 1], [], []>} : vector<16x256xbf16>, vector<256x128xbf16>, vector<16x128xf32> -> vector<16x128xf32>
    %3 = arith.truncf %2 : vector<16x128xf32> to vector<16x128xbf16>
    %c0_3 = arith.constant 0 : index
    %c0_4 = arith.constant 0 : index
    %4 = vector.load %arg3[%c0_3, %c0_4] : memref<16x128xbf16, #tpu.memory_space<vmem>>, vector<16x128xbf16>
    tpu.vector_store %arg3[%c0_3, %c0_4], %3 {strides = array<i32>} : memref<16x128xbf16, #tpu.memory_space<vmem>>, vector<16x128xbf16>,
    return
  }
  func.func @transform_0(%arg0: i32) -> (i32, i32) {
    %c0_i32 = arith.constant 0 : i32
    %c0_i32_0 = arith.constant 0 : i32
    return %arg0, %c0_i32 : i32, i32
  }
  func.func @transform_1(%arg0: i32) -> (i32, i32) {
    %c0_i32 = arith.constant 0 : i32
    %c0_i32_0 = arith.constant 0 : i32
    %c0_i32_1 = arith.constant 0 : i32
    return %c0_i32, %c0_i32_0 : i32, i32
  }
  func.func @transform_2(%arg0: i32) -> (i32, i32) {
    %c0_i32 = arith.constant 0 : i32
    %c0_i32_0 = arith.constant 0 : i32
    return %arg0, %c0_i32 : i32, i32
  }
}

</mosaic_0001>

<bundles_post_ra>
// kernel: tpu_custom_call.1
= control target key start
LH: loop header
LB: loop body
LE: loop exit
PB: predicated region body
PF: predicated region fallthrough
CT: control target
= control target key end

     0   :  { %7 = vsyncpa [#allocation3], 0  ;;  %s461_s0 = inlined_call_operand.hbm [shape: bf16[16,256], index: 0, kind: input, shape index: {}]   ;;  %s462_s1 = inlined_call_operand.hbm [shape: bf16[256,128], index: 1, kind: input, shape index: {}]   ;;  %s463_s2 = inlined_call_operand.hbm [shape: bf16[16,128], index: 2, kind: output, shape index: {}]  }
   0x1   :  { %8 = vsyncpa [#allocation6], 0 }
   0x2   :  { %9 = vsyncpa [#allocation4], 0  ;;  %s397_s9 = smov [#allocation2]   ;;  %s325_s13 = scalar_lea.hbm %s461_s0, 256 }
   0x3   :  { %s15_s10 = sshll.u32 %s397_s9, 4  ;;  %p326_p0 = scmp.ne.s32.totalorder %s461_s0, %s325_s13  ;;  %s16_s10 = int_to_ptr.vmem [resolvable:$true] %s15_s10 }
   0x4   :  { %p329_p1 = scmp.lt.u32.totalorder %s325_s13, %s461_s0 }
   0x6   :  { %p331_p2 = pnand %p329_p1, %p326_p0 }
   0x8   :  { %334 = shalt.err (!%p331_p2)
}
   0x9   :  { %s335_s18 = scalar_lea.vmem %s16_s10, 256  ;;  %p340_p4 = scmp.lt.s32.totalorder %s16_s10, %s16_s10 }
   0xa   :  { %p336_p3 = scmp.ne.s32.totalorder %s16_s10, %s335_s18  ;;  %p341_p5 = scmp.lt.s32.totalorder %s335_s18, %s335_s18 }
   0xc   :  { %p342_p6 = por %p341_p5, %p340_p4 }
   0xe   :  { %p343_p7 = pnand %p342_p6, %p336_p3 }
  0x10   :  { %346 = shalt.err (!%p343_p7)
}
  0x11   :  { %s398_s19 = smov 128   ;;  %s399_s20 = smov 8  }
  0x12   :  { %21 = dma.hbm_to_vmem [thread:$0]  %s461_s0, 256, %s16_s10, [#allocation3], %s398_s19, %s398_s19, %s399_s20  }
  0x13   :  { %s400_s23 = smov [#allocation5]   ;;  %s347_s27 = scalar_lea.hbm %s462_s1, 2048 }
  0x14   :  { %s27_s24 = sshll.u32 %s400_s23, 4  ;;  %p348_p8 = scmp.ne.s32.totalorder %s462_s1, %s347_s27  ;;  %s28_s24 = int_to_ptr.vmem [resolvable:$true] %s27_s24 }
  0x15   :  { %p351_p9 = scmp.lt.u32.totalorder %s347_s27, %s462_s1 }
  0x17   :  { %p353_p10 = pnand %p351_p9, %p348_p8 }
  0x19   :  { %356 = shalt.err (!%p353_p10)
}
  0x1a   :  { %s357_s4 = scalar_lea.vmem %s28_s24, 2048  ;;  %p362_p12 = scmp.lt.s32.totalorder %s28_s24, %s28_s24 }
  0x1b   :  { %p358_p11 = scmp.ne.s32.totalorder %s28_s24, %s357_s4  ;;  %p363_p13 = scmp.lt.s32.totalorder %s357_s4, %s357_s4 }
  0x1d   :  { %p364_p0 = por %p363_p13, %p362_p12 }
  0x1f   :  { %p365_p1 = pnand %p364_p0, %p358_p11 }
  0x21   :  { %368 = shalt.err (!%p365_p1)
}
  0x22   :  { %s401_s0 = smov 64   ;;  %s402_s5 = smov 4  }
  0x23   :  { %33 = dma.hbm_to_vmem [thread:$0]  %s462_s1, 2048, %s28_s24, [#allocation6], %s401_s0, %s401_s0, %s402_s5  }
  0x24   :  { %391 = dma.done.wait [#allocation3], 256  }
  0x25   :  { %392 = vsyncadd [#allocation3], 4294967040 }
  0x26   :  { %393 = dma.done.wait [#allocation6], 2048  }
  0x27   :  { %394 = vsyncadd [#allocation6], 4294965248  ;;  %v306_v0 = vld [vmem:[#allocation5 + $0x40] sm:$0xff]   ;;  %v308_v2 = vld [vmem:[#allocation5 + $0x48] sm:$0xff]   ;;  %s403_s1 = smov [#allocation7]  }
  0x28   :  { %v307_v1 = vld [vmem:[#allocation5] sm:$0xff]   ;;  %277 = vmatprep.subr.bf16.mxu0 %v306_v0  ;;  %v309_v3 = vld [vmem:[#allocation5 + $0x8] sm:$0xff]   ;;  %v310_v4 = vld [vmem:[#allocation5 + $0x50] sm:$0xff]   ;;  %s237_s8 = sshll.u32 %s403_s1, 4  ;;  %s238_s8 = int_to_ptr.vmem [resolvable:$true] %s237_s8 }
  0x29   :  { %278 = vmatpush3.bf16.msra.mxu0 %v307_v1  ;;  %v311_v5 = vld [vmem:[#allocation5 + $0x10] sm:$0xff]   ;;  %v312_v6 = vld [vmem:[#allocation5 + $0x58] sm:$0xff]   ;;  %v314_v8 = vld [vmem:[#allocation5 + $0x60] sm:$0xff]   ;;  %s369_s9 = scalar_lea.vmem %s238_s8, 128  ;;  %p374_p3 = scmp.lt.s32.totalorder %s238_s8, %s238_s8 }
  0x2a   :  { %279 = vmatprep.subr.bf16.mxu0 %v308_v2  ;;  %v313_v7 = vld [vmem:[#allocation5 + $0x18] sm:$0xff]   ;;  %v315_v9 = vld [vmem:[#allocation5 + $0x20] sm:$0xff]   ;;  %v316_v10 = vld [vmem:[#allocation5 + $0x68] sm:$0xff]   ;;  %p370_p2 = scmp.ne.s32.totalorder %s238_s8, %s369_s9  ;;  %p375_p4 = scmp.lt.s32.totalorder %s369_s9, %s369_s9 }
  0x2b   :  { %v324_v11 = vld [vmem:[#allocation2 + $0x4] ss:$8 sps:$4 sm:$0xff]   ;;  %v317_v12 = vld [vmem:[#allocation5 + $0x28] sm:$0xff]   ;;  %v322_v17 = vld [vmem:[#allocation2] ss:$8 sps:$4 sm:$0xff]  }
  0x2c   :  { %213 = vmatprep.mubr.bf16.mxu0 %v324_v11  ;;  %v318_v13 = vld [vmem:[#allocation5 + $0x70] sm:$0xff]   ;;  %v320_v15 = vld [vmem:[#allocation5 + $0x78] sm:$0xff]   ;;  %p376_p5 = por %p375_p4, %p374_p3 }
  0x2d   :  { %280 = vmatpush3.bf16.msra.mxu0 %v309_v3  ;;  %v319_v14 = vld [vmem:[#allocation5 + $0x30] sm:$0xff]   ;;  %v321_v16 = vld [vmem:[#allocation5 + $0x38] sm:$0xff]  }
  0x2e   :  { %281 = vmatprep.subr.bf16.mxu0 %v310_v4  ;;  %p377_p6 = pnand %p376_p5, %p370_p2 }
  0x31   :  { %282 = vmatpush3.bf16.msra.mxu0 %v311_v5 }
  0x32   :  { %283 = vmatprep.subr.bf16.mxu0 %v312_v6 }
  0x35   :  { %284 = vmatpush3.bf16.msra.mxu0 %v313_v7 }
  0x36   :  { %285 = vmatprep.subr.bf16.mxu0 %v314_v8 }
  0x39   :  { %286 = vmatpush3.bf16.msra.mxu0 %v315_v9 }
  0x3a   :  { %287 = vmatprep.subr.bf16.mxu0 %v316_v10 }
  0x3d   :  { %288 = vmatpush3.bf16.msra.mxu0 %v317_v12 }
  0x3e   :  { %289 = vmatprep.subr.bf16.mxu0 %v318_v13 }
  0x41   :  { %290 = vmatpush3.bf16.msra.mxu0 %v319_v14 }
  0x42   :  { %291 = vmatprep.subr.bf16.mxu0 %v320_v15 }
  0x45   :  { %292 = vmatpush3.bf16.msra.mxu0 %v321_v16 }
  0x48   :  { %214 = vmatmul.mubr.bf16.vlgmr.msra.gmra.mrb[0].mxu0 %v322_v17 }
 0x11b   :  { %v293_v18 = vpop.f32.mrb[0].mxu0 }
 0x11c   :  { %v294_v19 = vpop.f32.mrb[1].mxu0 }
 0x11d   :  { %v295_v20 = vadd.f32 %v294_v19, %v293_v18  ;;  %v296_v21 = vpop.f32.mrb[2].mxu0 }
 0x11e   :  { %v297_v22 = vpop.f32.mrb[3].mxu0 }
 0x11f   :  { %v298_v23 = vadd.f32 %v297_v22, %v296_v21 }
 0x121   :  { %v275_v24 = vpack.c.bf16 %v298_v23, %v295_v20 }
 0x123   :  { %276 = vst [vmem:[#allocation7] sm:$0xff] %v275_v24  }
 0x124   :  { %380 = shalt.err (!%p377_p6)
}
 0x125   :  { %s381_s12 = scalar_lea.hbm %s463_s2, 128 }
 0x126   :  { %p382_p7 = scmp.ne.s32.totalorder %s463_s2, %s381_s12  ;;  %p385_p8 = scmp.lt.u32.totalorder %s381_s12, %s463_s2 }
 0x128   :  { %p387_p9 = pnand %p385_p8, %p382_p7 }
 0x12a   :  { %390 = shalt.err (!%p387_p9)
}
 0x12b   :  { %243 = dma.vmem_to_hbm [thread:$0]  %s238_s8, 128, %s463_s2, [#allocation4], %s401_s0, %s401_s0, %s402_s5  }
 0x12c   :  { %395 = dma.done.wait [#allocation4], 128  }
 0x12d   :  { %396 = vsyncadd [#allocation4], 4294967168 }
 0x12e   :  { %247 = vsyncpa [#allocation3], 1 }
 0x12f   :  { %248 = vsyncpa [#allocation6], 1 }
 0x130   :  { %249 = vsyncpa [#allocation4], 1 }

</bundles_post_ra>
